<compile_context>
chip_gen: v7x
topology: tpu7x:2x2x1
jax: 0.10.0
libtpu: 0.0.40
codegen_flags: <defaults>
</compile_context>

<pallas_src>
import functools

import jax
import jax.numpy as jnp
from jax.experimental import pallas as pl
from jax.experimental.pallas import tpu as pltpu


def _choose_tm(m):
    """Lane tile: multiple of 128 (or the full row when short), VMEM-capped."""
    tm_max = 64 * 1024  # 2 bufs x (C+1) rows x 64K lanes x 4B ~= 2 MiB << 16 MiB
    if m <= 128:
        return m  # block dim == full array dim is always allowed
    return min(tm_max, (m // 128) * 128)


def _dice_sums_kernel(x_ref, t_ref, out_ref, acc_ref, *, class_num, m_total):
    # x_ref:  (1, C, TM)   log-probs (pre-exp), any float dtype
    # t_ref:  (1, 1, TM)   int32 class labels
    # out_ref:(1, class_num-1, 3) per-sample sums [intersect, sum_x, sum_t]
    # acc_ref:(class_num-1, 3) f32 VMEM accumulator, resident across m steps
    m = pl.program_id(1)
    n_m = pl.num_programs(1)
    tm = x_ref.shape[2]
    cm1 = class_num - 1

    @pl.when(m == 0)
    def _():
        acc_ref[...] = jnp.zeros_like(acc_ref)

    # Skip background channel 0 entirely (Dice only uses classes 1..C-1).
    xb = x_ref[0]                                          # (C, TM)
    x = xb[1:class_num, :].astype(jnp.float32)             # (cm1, TM)
    t = t_ref[0]                                           # (1, TM) int32

    e = jnp.exp(x)                                         # EUP
    class_ids = jax.lax.broadcasted_iota(jnp.int32, (cm1, 1), 0) + 1
    match = t == class_ids                                 # (cm1, TM) bool

    # Mask tail-tile padding (static check: only emitted when needed).
    if m_total % tm != 0:
        lane = jax.lax.broadcasted_iota(jnp.int32, (1, tm), 1)
        valid = (m * tm + lane) < m_total                  # (1, TM)
        e = jnp.where(valid, e, 0.0)
        match = jnp.logical_and(match, valid)

    tmask = match.astype(jnp.float32)
    inter = jnp.sum(e * tmask, axis=1, keepdims=True)      # (cm1, 1)
    sx = jnp.sum(e, axis=1, keepdims=True)                 # (cm1, 1)
    st = jnp.sum(tmask, axis=1, keepdims=True)             # (cm1, 1)
    acc_ref[...] += jnp.concatenate([inter, sx, st], axis=1)

    @pl.when(m == n_m - 1)
    def _():
        out_ref[0] = acc_ref[...]


def _dice_sums(x, t, class_num):
    """x: (N, C, M) float, t: (N, 1, M) int32 -> (N, class_num-1, 3) f32."""
    n, c, m = x.shape
    cm1 = class_num - 1
    tm = _choose_tm(m)
    n_m = pl.cdiv(m, tm)

    kernel = functools.partial(
        _dice_sums_kernel, class_num=class_num, m_total=m)

    return pl.pallas_call(
        kernel,
        out_shape=jax.ShapeDtypeStruct((n, cm1, 3), jnp.float32),
        grid_spec=pltpu.PrefetchScalarGridSpec(
            num_scalar_prefetch=0,
            grid=(n, n_m),
            in_specs=[
                pl.BlockSpec((1, c, tm), lambda i, j: (i, 0, j)),
                pl.BlockSpec((1, 1, tm), lambda i, j: (i, 0, j)),
            ],
            out_specs=pl.BlockSpec((1, cm1, 3), lambda i, j: (i, 0, 0)),
            scratch_shapes=[pltpu.VMEM((cm1, 3), jnp.float32)],
        ),
        compiler_params=pltpu.CompilerParams(
            dimension_semantics=("parallel", "arbitrary")),
    )(x, t)


def dice_loss(inp, target, class_num=3, smooth=1):
    """Matches DiceLoss.forward semantics.

    inp:    (N, C, H, W) float (log-probs; forward just exps it)
    target: (N, H, W) integer labels
    returns: shape (1,) float32
    """
    del smooth  # forward() overwrites self.smooth = 0.0
    n, c, h, w = inp.shape
    m = h * w

    x = inp.reshape(n, c, m)                     # free reshape, no transpose
    t = target.reshape(n, 1, m).astype(jnp.int32)

    sums = _dice_sums(x, t, class_num)           # (N, class_num-1, 3)
    totals = jnp.sum(sums, axis=0)               # (class_num-1, 3)
    inter = totals[:, 0]
    sum_x = totals[:, 1]
    sum_t = totals[:, 2]

    union = sum_x + sum_t
    empty = sum_t == 0.0
    safe_union = jnp.where(empty, 1.0, union)    # avoid 0/0 on unselected branch
    dice_i = jnp.where(empty, 1.0, (2.0 * inter) / safe_union)  # smooth = 0.0
    dice = jnp.sum(dice_i)
    loss = 1.0 - dice / (class_num - 1)
    return jnp.reshape(loss, (1,)).astype(jnp.float32)


if __name__ == "__main__":
    class_num = 3
    N, C, H, W = 2, class_num, 16, 16

    key = jax.random.PRNGKey(0)
    k1, k2 = jax.random.split(key)
    # log-probabilities-like input (any float works; forward just exps it)
    x = jax.nn.log_softmax(
        jax.random.normal(k1, (N, C, H, W), jnp.float32), axis=1)
    target = jax.random.randint(k2, (N, H, W), 0, class_num, jnp.int32)

    out = dice_loss(x, target, class_num=class_num)
    out = jax.block_until_ready(out)

    # lightweight pure-JAX reference check (same math, no Pallas)
    xe = jnp.exp(x)
    Dice = 0.0
    for i in range(1, class_num):
        xi = xe[:, i, :, :]
        ti = (target == i).astype(jnp.float32)
        inter = jnp.sum(xi * ti)
        union = jnp.sum(xi) + jnp.sum(ti)
        dice = jnp.where(jnp.sum(ti) == 0, 1.0, 2.0 * inter / union)
        Dice = Dice + dice
    ref = jnp.reshape(1.0 - Dice / (class_num - 1), (1,))
    assert jnp.allclose(out, ref, atol=1e-5, rtol=1e-5), (out, ref)

    print("KERNEL_OK")
</pallas_src>

<mosaic_0001>
module attributes {stable_mosaic.version = 11 : i64} {
  func.func @_dice_sums_kernel(%arg0: i32, %arg1: i32, %arg2: memref<1x3x256xf32, #tpu.memory_space<vmem>>, %arg3: memref<1x1x256xi32, #tpu.memory_space<vmem>>, %arg4: memref<1x2x3xf32, #tpu.memory_space<vmem>>, %arg5: memref<2x3xf32, #tpu.memory_space<vmem>>) attributes {dimension_semantics = [#tpu.dimension_semantics<parallel>, #tpu.dimension_semantics<arbitrary>], iteration_bounds = array<i64: 2, 1>, scalar_prefetch = 0 : i64, scratch_operands = 1 : i64, tpu.core_type = #tpu.core_type<tc>, window_params = [{transform_indices = @transform_0, window_bounds = array<i64: 1, 3, 256>}, {transform_indices = @transform_1, window_bounds = array<i64: 1, 1, 256>}, {transform_indices = @transform_2, window_bounds = array<i64: 1, 2, 3>}]} {
    %c0_i32 = arith.constant 0 : i32
    %0 = arith.cmpi eq, %arg1, %c0_i32 : i32
    %1 = arith.extui %0 : i1 to i32
    %c0_i32_0 = arith.constant 0 : i32
    %2 = arith.cmpi ne, %1, %c0_i32_0 : i32
    scf.if %2 {
      %cst_14 = arith.constant 0.000000e+00 : f32
      %31 = vector.broadcast %cst_14 : f32 to vector<2x3xf32>
      %c0_15 = arith.constant 0 : index
      %c0_16 = arith.constant 0 : index
      %32 = vector.load %arg5[%c0_15, %c0_16] : memref<2x3xf32, #tpu.memory_space<vmem>>, vector<2x3xf32>
      tpu.vector_store %arg5[%c0_15, %c0_16], %31 {strides = array<i32>} : memref<2x3xf32, #tpu.memory_space<vmem>>, vector<2x3xf32>,
    } else {
    }
    %c0 = arith.constant 0 : index
    %c0_1 = arith.constant 0 : index
    %c0_2 = arith.constant 0 : index
    %3 = vector.load %arg2[%c0, %c0_1, %c0_2] : memref<1x3x256xf32, #tpu.memory_space<vmem>>, vector<1x3x256xf32>
    %4 = vector.shape_cast %3 : vector<1x3x256xf32> to vector<3x256xf32>
    %5 = vector.extract_strided_slice %4 {offsets = [1, 0], sizes = [2, 256], strides = [1, 1]} : vector<3x256xf32> to vector<2x256xf32>
    %c0_3 = arith.constant 0 : index
    %c0_4 = arith.constant 0 : index
    %c0_5 = arith.constant 0 : index
    %6 = vector.load %arg3[%c0_3, %c0_4, %c0_5] : memref<1x1x256xi32, #tpu.memory_space<vmem>>, vector<1x1x256xi32>
    %7 = vector.shape_cast %6 : vector<1x1x256xi32> to vector<1x256xi32>
    %8 = math.exp %5 : vector<2x256xf32>
    %9 = tpu.iota {dimensions = array<i32: 0>} : vector<2x1xi32>
    %c1_i32 = arith.constant 1 : i32
    %10 = vector.broadcast %c1_i32 : i32 to vector<2x1xi32>
    %11 = arith.addi %9, %10 : vector<2x1xi32>
    %12 = vector.broadcast %7 : vector<1x256xi32> to vector<2x256xi32>
    %13 = vector.broadcast %11 : vector<2x1xi32> to vector<2x256xi32>
    %14 = arith.cmpi eq, %12, %13 : vector<2x256xi32>
    %15 = arith.extui %14 : vector<2x256xi1> to vector<2x256xi32>
    %16 = arith.sitofp %15 : vector<2x256xi32> to vector<2x256xf32>
    %17 = arith.mulf %8, %16 : vector<2x256xf32>
    %cst = arith.constant dense<0.000000e+00> : vector<2xf32>
    %18 = vector.multi_reduction <add>, %17, %cst [1] : vector<2x256xf32> to vector<2xf32>
    %19 = vector.shape_cast %18 : vector<2xf32> to vector<2x1xf32>
    %cst_6 = arith.constant dense<0.000000e+00> : vector<2xf32>
    %20 = vector.multi_reduction <add>, %8, %cst_6 [1] : vector<2x256xf32> to vector<2xf32>
    %21 = vector.shape_cast %20 : vector<2xf32> to vector<2x1xf32>
    %cst_7 = arith.constant dense<0.000000e+00> : vector<2xf32>
    %22 = vector.multi_reduction <add>, %16, %cst_7 [1] : vector<2x256xf32> to vector<2xf32>
    %23 = vector.shape_cast %22 : vector<2xf32> to vector<2x1xf32>
    %c0_8 = arith.constant 0 : index
    %c0_9 = arith.constant 0 : index
    %24 = vector.load %arg5[%c0_8, %c0_9] : memref<2x3xf32, #tpu.memory_space<vmem>>, vector<2x3xf32>
    %25 = tpu.concatenate %19, %21, %23 in 1 : vector<2x1xf32>, vector<2x1xf32>, vector<2x1xf32> -> vector<2x3xf32>
    %26 = arith.addf %24, %25 : vector<2x3xf32>
    %c0_10 = arith.constant 0 : index
    %c0_11 = arith.constant 0 : index
    %27 = vector.load %arg5[%c0_10, %c0_11] : memref<2x3xf32, #tpu.memory_space<vmem>>, vector<2x3xf32>
    tpu.vector_store %arg5[%c0_10, %c0_11], %26 {strides = array<i32>} : memref<2x3xf32, #tpu.memory_space<vmem>>, vector<2x3xf32>,
    %c0_i32_12 = arith.constant 0 : i32
    %28 = arith.cmpi eq, %arg1, %c0_i32_12 : i32
    %29 = arith.extui %28 : i1 to i32
    %c0_i32_13 = arith.constant 0 : i32
    %30 = arith.cmpi ne, %29, %c0_i32_13 : i32
    scf.if %30 {
      %c0_14 = arith.constant 0 : index
      %c0_15 = arith.constant 0 : index
      %31 = vector.load %arg5[%c0_14, %c0_15] : memref<2x3xf32, #tpu.memory_space<vmem>>, vector<2x3xf32>
      %c0_16 = arith.constant 0 : index
      %c0_17 = arith.constant 0 : index
      %c0_18 = arith.constant 0 : index
      %32 = vector.load %arg4[%c0_16, %c0_17, %c0_18] : memref<1x2x3xf32, #tpu.memory_space<vmem>>, vector<1x2x3xf32>
      %33 = vector.shape_cast %32 : vector<1x2x3xf32> to vector<2x3xf32>
      %34 = vector.shape_cast %31 : vector<2x3xf32> to vector<1x2x3xf32>
      tpu.vector_store %arg4[%c0_16, %c0_17, %c0_18], %34 {strides = array<i32>} : memref<1x2x3xf32, #tpu.memory_space<vmem>>, vector<1x2x3xf32>,
    } else {
    }
    return
  }
  func.func @transform_0(%arg0: i32, %arg1: i32) -> (i32, i32, i32) {
    %c0_i32 = arith.constant 0 : i32
    %c0_i32_0 = arith.constant 0 : i32
    return %arg0, %c0_i32, %arg1 : i32, i32, i32
  }
  func.func @transform_1(%arg0: i32, %arg1: i32) -> (i32, i32, i32) {
    %c0_i32 = arith.constant 0 : i32
    %c0_i32_0 = arith.constant 0 : i32
    return %arg0, %c0_i32, %arg1 : i32, i32, i32
  }
  func.func @transform_2(%arg0: i32, %arg1: i32) -> (i32, i32, i32) {
    %c0_i32 = arith.constant 0 : i32
    %c0_i32_0 = arith.constant 0 : i32
    %c0_i32_1 = arith.constant 0 : i32
    return %arg0, %c0_i32, %c0_i32_0 : i32, i32, i32
  }
}

</mosaic_0001>

<bundles_post_ra>
// kernel: tpu_custom_call.1
= control target key start
LH: loop header
LB: loop body
LE: loop exit
PB: predicated region body
PF: predicated region fallthrough
CT: control target
= control target key end

     0   :  { %7 = vsyncpa [#allocation4], 0  ;;  %s669_s0 = inlined_call_operand.vmem [shape: f32[2,3,256], index: 0, kind: input, shape index: {}]   ;;  %s670_s1 = inlined_call_operand.vmem [shape: s32[2,1,256], index: 1, kind: input, shape index: {}]   ;;  %s671_s2 = inlined_call_operand.hbm [shape: f32[2,2,3], index: 2, kind: output, shape index: {}]  }
   0x1   :  { %9 = vsyncpa [#allocation4 + $0x1], 0  ;;  %s551_s9 = smov 0   ;;  %s553_s10 = smov 0  }
   0x2   :  { %s555_s11 = smov 0   ;;  %s557_s12 = smov 0  }
   0x3   :  { %s559_s13 = smov 0   ;;  %s561_s14 = smov 0  }
   0x4 LB: > { %s380_s15 = sadd.s32 4294967295, %s532_s14   ;;  %s381_s16 = sadd.s32 4294967294, %s532_s14   ;;  %s532_s14 = sphi %s561_s14, %s15_s14   ;;  %s528_s13 = sphi %s559_s13, %s678_s13   ;;  %s524_s12 = sphi %s557_s12, %s677_s12   ;;  %s520_s11 = sphi %s555_s11, %s676_s11   ;;  %s516_s10 = sphi %s553_s10, %s675_s10   ;;  %s512_s9 = sphi %s551_s9, %s674_s9  }
   0x5   : > { %s27_s17 = sadd.s32 1, %s528_s13  ;;  %s90_s18 = sadd.s32 1, %s520_s11 }
   0x6   : > { %p29_p0 = scmp.ge.s32.totalorder %s27_s17, 2  ;;  %p100_p1 = scmp.ne.s32.totalorder %s520_s11, %s516_s10 }
   0x7   : > { %p101_p2 = scmp.eq.s32.totalorder %s380_s15, 1  ;;  %p106_p3 = scmp.ne.s32.totalorder %s516_s10, %s512_s9 }
   0x8   : > { %s680_s17 = smov (%p29_p0, %s27_s17), 0  ;;  %p107_p5 = scmp.eq.s32.totalorder %s381_s16, 1 }
   0x9   : > { %p591_p4 = por %p101_p2, %p100_p1  ;;  %s87_s20 = ssub.s32 %s528_s13, %s680_s17 }
   0xa   : > { %p384_p6 = scmp.ge.s32.totalorder %s532_s14, 1  ;;  %p88_p7 = scmp.eq.s32.totalorder %s87_s20, 0 }
   0xb   : > { %p598_p8 = por %p107_p5, %p106_p3  ;;  %p150_p9 = scmp.lt.s32.totalorder %s532_s14, 3 }
   0xc   : > { %s604_s22 = scalar_select %p88_p7, %s520_s11, %s90_s18  }
   0xd   : > { %p151_p10 = pnand %p384_p6, %p150_p9 }
   0xe   : > { %p185_p11 = scmp.lt.s32.totalorder (!%p151_p10), %s524_s12, 1  ;;  %v213_v0 = vlaneseq (!%p151_p10)  ;;  %vm253_vm0 = vcmask (!%p151_p10), 1041408   ;;  %v534_v10 = vmov (!%p151_p10), 0.0   ;;  %vm239_vm3 = vcmask (!%p151_p10), 1042433   ;;  %s181_s4 = sand.u32 (!%p151_p10), 1, %s516_s10  }
   0xf   : > { %154 = sbr.rel (%p151_p10) target bundleno = 218 (0xda), region = 28  ;;  %vm207_vm4 = vcmask (!%p151_p10), 17408   ;;  %vm263_vm5 = vcmask (!%p151_p10), 7168   ;;  %vm265_vm6 = vcmask (!%p151_p10), 15360   ;;  %s385_s5 = sshll.u32 (!%p151_p10), %s181_s4, 1 }
  0x10   : > { %v214_v1 = vshrl.u32 (!%p151_p10), %v213_v0, 7  ;;  %208 = vst.msk [vmem:[#allocation2] sm:$0x3] (!%p151_p10), %vm207_vm4, %v534_v10  ;;  %s392_s6 = sshll.u32 (!%p151_p10), %s524_s12, 5  ;;  %s183_s7 = scalar_lea.vmem (!%p151_p10), [#allocation3], %s385_s5 }
  0x11   : > { %s292_s8 = sshll.u32 (!%p151_p10), %s183_s7, 4  ;;  %s621_s18 = scalar_lea.hbm (!%p151_p10), %s671_s2, %s392_s6  ;;  %s623_s8 = int_to_ptr.vmem [resolvable:$true] %s292_s8 }
  0x12   : > { %v218_v2 = vsub.s32 (!%p151_p10), 0, %v214_v1  ;;  %v222_v3 = vsub.s32 (!%p151_p10), 1, %v214_v1  ;;  %v215_v4 = vadd.s32 (!%p151_p10), 1, %v214_v1  ;;  %s279_s20 = scalar_lea.sflag (!%p151_p10), [#allocation4], %s181_s4 }
  0x16   : > { %s186_s23 = scalar_select %p185_p11, %s524_s12, 1 }
  0x17   : > { %v259_v34 = vld [vmem:[#allocation2] sm:$0x3]  ;;  %s535_s12 = smov [#allocation3]  }
  0x18   : > { %s388_s24 = sshll.u32 %s186_s23, 1  ;;  %s395_s25 = sshll.u32 %s186_s23, 3 }
  0x19   : > { %s201_s28 = scalar_lea.vmem %s670_s1, %s388_s24  ;;  %s192_s3 = scalar_lea.vmem %s669_s0, %s395_s25 }
  0x1a   : > { %v210_v5 = vld [vmem:[%s201_s28] sm:$0x3]  ;;  %s454_s23 = scalar_lea.vmem %s623_s8, 32  ;;  %s458_s24 = sshll.u32 %s535_s12, 4  ;;  %s459_s24 = int_to_ptr.vmem [resolvable:$false] %s458_s24 }
  0x1b   : > { %v209_v6 = vld [vmem:[%s192_s3] sm:$0x77]  ;;  %v219_v7 = vrot.slane %v210_v5, %v218_v2  ;;  %v223_v8 = vrot.slane %v210_v5, %v222_v3  ;;  %p455_p12 = scmp.ne.s32.totalorder %s623_s8, %s454_s23  ;;  %s460_s25 = scalar_lea.vmem %s459_s24, 64 }
  0x1c   : > { %v211_v9 = vmul.f32 1.442695, %v209_v6  ;;  %p461_p1 = scmp.lt.s32.totalorder %s623_s8, %s459_s24  ;;  %p462_p2 = scmp.lt.s32.totalorder %s460_s25, %s454_s23 }
  0x1d   : > { %vm224_vm1 = vcmp.eq.s32.totalorder %v219_v7, %v215_v4  ;;  %vm225_vm2 = vcmp.eq.s32.totalorder %v223_v8, %v215_v4  ;;  %p456_p13 = pnand %p455_p12, %p591_p4 }
  0x1e   : > { %452 = vpow2.f32 %v211_v9  ;;  %v389_v11 = vsel %vm224_vm1, 1.0, %v534_v10  ;;  %v390_v12 = vsel %vm225_vm2, 1.0, %v534_v10  ;;  %p463_p3 = por %p462_p2, %p461_p1 }
  0x1f   : > { %v254_v13 = vsel %vm253_vm0, %v389_v11, 0.0  ;;  %v255_v14 = vsel %vm253_vm0, %v390_v12, 0.0  ;;  %v232_v16 = vcombine.low %v389_v11, %v390_v12  ;;  %p457_p0 = pneg %p456_p13 }
  0x20   : > { %v256_v15 = vadd.f32 %v255_v14, %v254_v13 }
  0x21   : > { %v233_v17 = vrot.slane %v232_v16, 7  ;;  %p464_p5 = pnand %p463_p3, %p457_p0 }
  0x22   : > { %257 = vadd.xlane.f32.xlu0 %v256_v15 }
  0x28   : > { %v453_v18 = vpop.eup %452 }
  0x29   : > { %v246_v19 = vcombine.high %v453_v18, %v453_v18  ;;  %v248_v20 = vsel %vm239_vm3, %v453_v18, 0.0  ;;  %v235_v21 = vmul.f32 %v453_v18, %v233_v17 }
  0x2b   : > { %v249_v22 = vsel %vm239_vm3, %v246_v19, 0.0  ;;  %v237_v23 = vcombine.high %v235_v21, %v235_v21  ;;  %v240_v24 = vsel %vm239_vm3, %v235_v21, 0.0 }
  0x2c   : > { %v250_v25 = vadd.f32 %v249_v22, %v248_v20 }
  0x2d   : > { %v241_v26 = vsel %vm239_vm3, %v237_v23, 0.0 }
  0x2e   : > { %251 = vadd.xlane.f32.xlu1 %v250_v25  ;;  %v242_v27 = vadd.f32 %v241_v26, %v240_v24 }
  0x30   : > { %243 = vadd.xlane.f32.xlu0 %v242_v27 }
  0xaf   : > { %v258_v28 = vpop.xlane.xlu0 %257 }
  0xb0   : > { %v261_v30 = vrot.slane %v258_v28, 7 }
  0xbb   : > { %v252_v29 = vpop.xlane.xlu1 %251 }
  0xbd   : > { %v244_v31 = vpop.xlane.xlu0 %243 }
  0xbe   : > { %v264_v32 = vsel %vm263_vm5, %v244_v31, %v252_v29 }
  0xbf   : > { %v266_v33 = vsel %vm265_vm6, %v264_v32, %v261_v30 }
  0xc0   : > { %v268_v35 = vrot.slane %v266_v33, 1 }
  0xc2   : > { %v270_v36 = vadd.f32 %v268_v35, %v259_v34 }
  0xc4   : > { %272 = vst.msk [vmem:[#allocation2] sm:$0x3] %vm207_vm4, %v270_v36 }
  0xcb   : > { %v276_v37 = vld [vmem:[#allocation2] sm:$0x3] }
  0xcc   : > { %277 = vst.msk [vmem:[%s183_s7] sm:$0x3] %vm207_vm4, %v276_v37 }
  0xcd   : > { %467 = shalt.err (!%p464_p5)
}
  0xce   : > { %s468_s26 = scalar_lea.hbm %s621_s18, 32  ;;  %s472_s29 = scalar_lea.hbm %s671_s2, 64 }
  0xcf   : > { %p469_p6 = scmp.ne.s32.totalorder %s621_s18, %s468_s26  ;;  %p473_p10 = scmp.lt.u32.totalorder %s621_s18, %s671_s2 }
  0xd0   : > { %p474_p11 = scmp.lt.u32.totalorder %s472_s29, %s468_s26  ;;  %p476_p13 = scmp.lt.u32.totalorder %s468_s26, %s621_s18 }
  0xd1   : > { %p470_p7 = pnand %p469_p6, %p591_p4 }
  0xd2   : > { %p475_p12 = por %p474_p11, %p473_p10 }
  0xd3   : > { %p471_p9 = pneg %p470_p7 }
  0xd4   : > { %p477_p0 = por %p476_p13, %p475_p12 }
  0xd6   : > { %p478_p1 = pnand %p477_p0, %p471_p9 }
  0xd8   : > { %481 = shalt.err (!%p478_p1)
}
  0xd9   : > { %396 = dma.vmem_to_hbm [thread:$0]  (%p591_p4), %s623_s8, 32, %s621_s18, %s279_s20  }
  0xda PF: > { %p402_p2 = scmp.ge.s32.totalorder %s532_s14, 2  ;;  %s304_s4 = sand.u32 1, %s512_s9  }
  0xdb   : > { %s305_s5 = scalar_lea.sflag [#allocation4], %s304_s4 }
  0xdc   : > { %p399_p3 = pnand %p402_p2, %p598_p8 }
  0xde   : > { %507 = dma.done.wait (!%p399_p3), %s305_s5, 32  }
  0xdf   : > { %509 = vsyncadd (!%p399_p3), %s305_s5, 4294967264  ;;  %s15_s14 = sadd.s32 1, %s532_s14   ;;  %s674_s9 = smov %s516_s10 }
  0xe0   : > { %p12_p5 = scmp.ge.s32.totalorder %s15_s14, 4   ;;  %s675_s10 = smov %s520_s11 }
  0xe1   : > { %s676_s11 = smov %s604_s22  ;;  %s677_s12 = smov %s528_s13 }
  0xe2   : > { %s678_s13 = smov %s680_s17  ;;  %14 = sbr.rel (!%p12_p5) target bundleno = 4 (0x4), region = 74 }
  0xe9   :  { %310 = vsyncpa [#allocation4], 1 }
  0xea   :  { %312 = vsyncpa [#allocation4 + $0x1], 1 }

</bundles_post_ra>
